<compile_context>
chip_gen: v6e
topology: v6e:2x2x1
jax: 0.10.0
libtpu: 0.0.40
codegen_flags: <defaults>
</compile_context>

<pallas_src>
import functools

import jax
import jax.numpy as jnp
from jax.experimental import pallas as pl
from jax.experimental.pallas import tpu as pltpu


# ---------------------------------------------------------------------------
# Tiling helpers
# ---------------------------------------------------------------------------
def _round_up(x: int, m: int) -> int:
    return (x + m - 1) // m * m


def _choose_tiles(B: int, IN: int, OUT: int):
    """MXU-friendly tiles: >=128 lanes on N/K, sublane-aligned M."""
    tm = min(128, _round_up(B, 8))        # batch tile (sublane axis)
    tn = min(256, _round_up(OUT, 128))    # per-linear output tile (lane axis)
    tk = min(512, _round_up(IN, 128))     # reduction tile
    return tm, tn, tk


# ---------------------------------------------------------------------------
# One-time parameter packing (hoist to model init in a real pipeline)
# ---------------------------------------------------------------------------
def prepare_maxout_params(w1, b1, w2, b2, *, tn, n_pad, k_pad,
                          compute_dtype=jnp.float32):
    """Pack W1/W2 ([OUT, IN], PyTorch layout) into one tile-interleaved fused
    weight [K_pad, 2*N_pad] and a fused bias [1, 2*N_pad].

    Layout: for each output tile j of width tn, the fused columns
    [j*2*tn : j*2*tn+tn] hold W1's tile j and [j*2*tn+tn : (j+1)*2*tn] hold W2's,
    so the kernel gets both halves of output tile j in a single contiguous block.
    """
    OUT, IN = w1.shape
    nj = n_pad // tn

    def prep_w(w):
        wt = w.T.astype(compute_dtype)                       # [IN, OUT]
        return jnp.pad(wt, ((0, k_pad - IN), (0, n_pad - OUT)))

    w1p, w2p = prep_w(w1), prep_w(w2)
    w_fused = jnp.concatenate(
        [w1p.reshape(k_pad, nj, tn), w2p.reshape(k_pad, nj, tn)], axis=2
    ).reshape(k_pad, nj * 2 * tn)

    def prep_b(b):
        return jnp.pad(b.astype(jnp.float32), (0, n_pad - OUT)).reshape(1, n_pad)

    b1p, b2p = prep_b(b1), prep_b(b2)
    b_fused = jnp.concatenate(
        [b1p.reshape(1, nj, tn), b2p.reshape(1, nj, tn)], axis=2
    ).reshape(1, nj * 2 * tn)

    return w_fused, b_fused


# ---------------------------------------------------------------------------
# Kernels
# ---------------------------------------------------------------------------
def maxout_linear_kernel_single_k(x_ref, w_ref, b_ref, o_ref):
    """Whole reduction fits in one tile: no scratch, no branches."""
    tn = o_ref.shape[1]
    # [tm, K] @ [K, 2*tn] -> f32 [tm, 2*tn] on the MXU, bias in f32.
    y = jnp.dot(x_ref[...], w_ref[...],
                preferred_element_type=jnp.float32) + b_ref[...]
    o_ref[...] = jnp.maximum(y[:, :tn], y[:, tn:]).astype(o_ref.dtype)


def maxout_linear_kernel_multi_k(x_ref, w_ref, b_ref, o_ref, acc_ref):
    k = pl.program_id(2)

    @pl.when(k == 0)
    def _init():
        acc_ref[...] = jnp.zeros_like(acc_ref)

    # Single fused matmul: [tm, tk] @ [tk, 2*tn] -> f32 [tm, 2*tn] on the MXU.
    acc_ref[...] += jnp.dot(x_ref[...], w_ref[...],
                            preferred_element_type=jnp.float32)

    @pl.when(k == pl.num_programs(2) - 1)
    def _finalize():
        tn = o_ref.shape[1]
        y = acc_ref[...] + b_ref[...]            # bias added once, in f32
        # Maxout epilogue in f32 (safe on v5e: no bf16 VALU), then cast + store.
        o_ref[...] = jnp.maximum(y[:, :tn], y[:, tn:]).astype(o_ref.dtype)


# ---------------------------------------------------------------------------
# Wrapper
# ---------------------------------------------------------------------------
def maxout_linear_apply(x, w_fused, b_fused, out_features, *, tm, tn, tk,
                        compute_dtype=jnp.float32):
    """x: [B, IN]; w_fused: [K_pad, 2*N_pad]; b_fused: [1, 2*N_pad]."""
    B, IN = x.shape
    k_pad = w_fused.shape[0]
    n_pad = w_fused.shape[1] // 2
    b_pad = _round_up(B, tm)

    x_p = jnp.pad(x.astype(compute_dtype), ((0, b_pad - B), (0, k_pad - IN)))

    k_steps = k_pad // tk

    cost = pl.CostEstimate(
        flops=2 * b_pad * k_pad * (2 * n_pad),
        transcendentals=0,
        bytes_accessed=(x_p.size * x_p.dtype.itemsize
                        + w_fused.size * w_fused.dtype.itemsize
                        + b_fused.size * b_fused.dtype.itemsize
                        + b_pad * n_pad * x.dtype.itemsize),
    )

    if k_steps == 1:
        # Single-pass variant: 2-D grid, no accumulator scratch, direct store.
        kernel = maxout_linear_kernel_single_k
        grid = (b_pad // tm, n_pad // tn)
        in_specs = [
            pl.BlockSpec((tm, tk), lambda i, j: (i, 0)),          # x tile
            pl.BlockSpec((tk, 2 * tn), lambda i, j: (0, j)),      # fused W tile
            pl.BlockSpec((1, 2 * tn), lambda i, j: (0, j)),       # fused bias
        ]
        out_specs = pl.BlockSpec((tm, tn), lambda i, j: (i, j))
        scratch_shapes = []
        dim_sem = ("parallel", "parallel")
    else:
        kernel = maxout_linear_kernel_multi_k
        grid = (b_pad // tm, n_pad // tn, k_steps)
        in_specs = [
            pl.BlockSpec((tm, tk), lambda i, j, k: (i, k)),       # x tile
            pl.BlockSpec((tk, 2 * tn), lambda i, j, k: (k, j)),   # fused W tile
            pl.BlockSpec((1, 2 * tn), lambda i, j, k: (0, j)),    # fused bias
        ]
        out_specs = pl.BlockSpec((tm, tn), lambda i, j, k: (i, j))
        scratch_shapes = [pltpu.VMEM((tm, 2 * tn), jnp.float32)]
        dim_sem = ("parallel", "parallel", "arbitrary")

    out_padded = pl.pallas_call(
        kernel,
        out_shape=jax.ShapeDtypeStruct((b_pad, n_pad), x.dtype),
        grid_spec=pltpu.PrefetchScalarGridSpec(
            num_scalar_prefetch=0,
            grid=grid,
            in_specs=in_specs,
            out_specs=out_specs,
            scratch_shapes=scratch_shapes,
        ),
        compiler_params=pltpu.CompilerParams(
            dimension_semantics=dim_sem,
            vmem_limit_bytes=32 * 1024 * 1024,
        ),
        cost_estimate=cost,
    )(x_p, w_fused, b_fused)

    return out_padded[:B, :out_features]


def maxout_linear(x, w1, b1, w2, b2, *, compute_dtype=jnp.float32):
    """Convenience wrapper: packs params then applies the kernel.
    In a real model, prepare_maxout_params() runs once at init, not per call."""
    B, IN = x.shape
    OUT = w1.shape[0]
    tm, tn, tk = _choose_tiles(B, IN, OUT)
    n_pad = _round_up(OUT, tn)
    k_pad = _round_up(IN, tk)
    w_fused, b_fused = prepare_maxout_params(
        w1, b1, w2, b2, tn=tn, n_pad=n_pad, k_pad=k_pad,
        compute_dtype=compute_dtype)
    return maxout_linear_apply(x, w_fused, b_fused, OUT,
                               tm=tm, tn=tn, tk=tk, compute_dtype=compute_dtype)


# ---------------------------------------------------------------------------
# Demo / correctness check
# ---------------------------------------------------------------------------
if __name__ == "__main__":
    run = jax.jit(functools.partial(maxout_linear, compute_dtype=jnp.float32))

    # --- Test 1: small shapes (single-K-step fast path), tight tolerance -----
    B, IN, OUT = 8, 32, 64
    key = jax.random.PRNGKey(0)
    kx, kw1, kb1, kw2, kb2 = jax.random.split(key, 5)

    # Deterministic init mimicking PyTorch Linear's U(-1/sqrt(IN), 1/sqrt(IN)).
    bound = 1.0 / (IN ** 0.5)
    x = jax.random.normal(kx, (B, IN), dtype=jnp.float32)
    w1 = jax.random.uniform(kw1, (OUT, IN), minval=-bound, maxval=bound, dtype=jnp.float32)
    b1 = jax.random.uniform(kb1, (OUT,), minval=-bound, maxval=bound, dtype=jnp.float32)
    w2 = jax.random.uniform(kw2, (OUT, IN), minval=-bound, maxval=bound, dtype=jnp.float32)
    b2 = jax.random.uniform(kb2, (OUT,), minval=-bound, maxval=bound, dtype=jnp.float32)

    out = run(x, w1, b1, w2, b2)
    jax.block_until_ready(out)

    ref = jnp.maximum(x @ w1.T + b1, x @ w2.T + b2)
    assert out.shape == (B, OUT)
    assert jnp.allclose(out, ref, atol=1e-5, rtol=1e-5)

    # --- Test 2: larger reduction (exercises the K-accumulation path) --------
    B2, IN2, OUT2 = 16, 1024, 256
    key2 = jax.random.PRNGKey(1)
    kx, kw1, kb1, kw2, kb2 = jax.random.split(key2, 5)
    bound2 = 1.0 / (IN2 ** 0.5)
    x2 = jax.random.normal(kx, (B2, IN2), dtype=jnp.float32)
    w1_2 = jax.random.uniform(kw1, (OUT2, IN2), minval=-bound2, maxval=bound2, dtype=jnp.float32)
    b1_2 = jax.random.uniform(kb1, (OUT2,), minval=-bound2, maxval=bound2, dtype=jnp.float32)
    w2_2 = jax.random.uniform(kw2, (OUT2, IN2), minval=-bound2, maxval=bound2, dtype=jnp.float32)
    b2_2 = jax.random.uniform(kb2, (OUT2,), minval=-bound2, maxval=bound2, dtype=jnp.float32)

    out2 = run(x2, w1_2, b1_2, w2_2, b2_2)
    jax.block_until_ready(out2)

    ref2 = jnp.maximum(x2 @ w1_2.T + b1_2, x2 @ w2_2.T + b2_2)
    assert out2.shape == (B2, OUT2)
    assert jnp.allclose(out2, ref2, atol=2e-2, rtol=2e-2)

    print("KERNEL_OK")
</pallas_src>

<mosaic_0001>
module attributes {stable_mosaic.version = 11 : i64} {
  func.func @maxout_linear_kernel_single_k(%arg0: i32, %arg1: i32, %arg2: memref<8x128xf32, #tpu.memory_space<vmem>>, %arg3: memref<128x256xf32, #tpu.memory_space<vmem>>, %arg4: memref<1x256xf32, #tpu.memory_space<vmem>>, %arg5: memref<8x128xf32, #tpu.memory_space<vmem>>) attributes {dimension_semantics = [#tpu.dimension_semantics<parallel>, #tpu.dimension_semantics<parallel>], iteration_bounds = array<i64: 1, 1>, scalar_prefetch = 0 : i64, scratch_operands = 0 : i64, tpu.core_type = #tpu.core_type<tc>, window_params = [{transform_indices = @transform_0, window_bounds = array<i64: 8, 128>}, {transform_indices = @transform_1, window_bounds = array<i64: 128, 256>}, {transform_indices = @transform_2, window_bounds = array<i64: 1, 256>}, {transform_indices = @transform_3, window_bounds = array<i64: 8, 128>}]} {
    %c0 = arith.constant 0 : index
    %c0_0 = arith.constant 0 : index
    %0 = vector.load %arg2[%c0, %c0_0] : memref<8x128xf32, #tpu.memory_space<vmem>>, vector<8x128xf32>
    %c0_1 = arith.constant 0 : index
    %c0_2 = arith.constant 0 : index
    %1 = vector.load %arg3[%c0_1, %c0_2] : memref<128x256xf32, #tpu.memory_space<vmem>>, vector<128x256xf32>
    %cst = arith.constant dense<0.000000e+00> : vector<8x256xf32>
    %2 = tpu.matmul %0, %1, %cst {dimension_numbers = #tpu.dot_dimension_numbers<[1], [0], [0], [1], [0, 0, 1, 1], [], []>} : vector<8x128xf32>, vector<128x256xf32>, vector<8x256xf32> -> vector<8x256xf32>
    %c0_3 = arith.constant 0 : index
    %c0_4 = arith.constant 0 : index
    %3 = vector.load %arg4[%c0_3, %c0_4] : memref<1x256xf32, #tpu.memory_space<vmem>>, vector<1x256xf32>
    %4 = vector.broadcast %3 : vector<1x256xf32> to vector<8x256xf32>
    %5 = arith.addf %2, %4 : vector<8x256xf32>
    %6 = vector.extract_strided_slice %5 {offsets = [0, 0], sizes = [8, 128], strides = [1, 1]} : vector<8x256xf32> to vector<8x128xf32>
    %7 = vector.extract_strided_slice %5 {offsets = [0, 128], sizes = [8, 128], strides = [1, 1]} : vector<8x256xf32> to vector<8x128xf32>
    %8 = arith.maximumf %6, %7 : vector<8x128xf32>
    %c0_5 = arith.constant 0 : index
    %c0_6 = arith.constant 0 : index
    %9 = vector.load %arg5[%c0_5, %c0_6] : memref<8x128xf32, #tpu.memory_space<vmem>>, vector<8x128xf32>
    tpu.vector_store %arg5[%c0_5, %c0_6], %8 {strides = array<i32>} : memref<8x128xf32, #tpu.memory_space<vmem>>, vector<8x128xf32>,
    return
  }
  func.func @transform_0(%arg0: i32, %arg1: i32) -> (i32, i32) {
    %c0_i32 = arith.constant 0 : i32
    %c0_i32_0 = arith.constant 0 : i32
    return %arg0, %c0_i32 : i32, i32
  }
  func.func @transform_1(%arg0: i32, %arg1: i32) -> (i32, i32) {
    %c0_i32 = arith.constant 0 : i32
    %c0_i32_0 = arith.constant 0 : i32
    return %c0_i32, %arg1 : i32, i32
  }
  func.func @transform_2(%arg0: i32, %arg1: i32) -> (i32, i32) {
    %c0_i32 = arith.constant 0 : i32
    %c0_i32_0 = arith.constant 0 : i32
    return %c0_i32, %arg1 : i32, i32
  }
  func.func @transform_3(%arg0: i32, %arg1: i32) -> (i32, i32) {
    %c0_i32 = arith.constant 0 : i32
    return %arg0, %arg1 : i32, i32
  }
}

</mosaic_0001>

<bundles_post_ra>
// kernel: maxout_linear.1
= control target key start
LH: loop header
LB: loop body
LE: loop exit
PB: predicated region body
PF: predicated region fallthrough
CT: control target
= control target key end

     0   :  { %v171_v4 = vmov 0.0   ;;  %s298_s0 = inlined_call_operand.vmem [shape: f32[8,128], index: 0, kind: input, shape index: {}]   ;;  %s299_s1 = inlined_call_operand.vmem [shape: f32[128,256], index: 1, kind: input, shape index: {}]   ;;  %s300_s2 = inlined_call_operand.vmem [shape: f32[1,256], index: 2, kind: input, shape index: {}]   ;;  %s301_s3 = inlined_call_operand.hbm [shape: f32[8,128], index: 3, kind: output, shape index: {}]  }
   0x1   :  { %v47_v0 = vld [vmem:[%s299_s1 + $0xf8] sm:$0xff]  ;;  %v46_v1 = vld [vmem:[%s299_s1 + $0xf0] sm:$0xff]  ;;  %v45_v2 = vld [vmem:[%s299_s1 + $0xe8] sm:$0xff]  ;;  %124 = vmatprep.mubr.f32.mxu0 %v171_v4 }
   0x2   :  { %60 = vmatprep.subr.mxu0 %v47_v0  ;;  %v44_v3 = vld [vmem:[%s299_s1 + $0xe0] sm:$0xff]  ;;  %v43_v5 = vld [vmem:[%s299_s1 + $0xd8] sm:$0xff]  ;;  %v42_v6 = vld [vmem:[%s299_s1 + $0xd0] sm:$0xff] }
   0x3   :  { %61 = vmatpush1.msra.mxu0 %v46_v1  ;;  %v41_v7 = vld [vmem:[%s299_s1 + $0xc8] sm:$0xff]  ;;  %v40_v8 = vld [vmem:[%s299_s1 + $0xc0] sm:$0xff]  ;;  %v39_v9 = vld [vmem:[%s299_s1 + $0xb8] sm:$0xff] }
   0x4   :  { %62 = vmatprep.subr.mxu0 %v45_v2  ;;  %v38_v10 = vld [vmem:[%s299_s1 + $0xb0] sm:$0xff]  ;;  %v37_v11 = vld [vmem:[%s299_s1 + $0xa8] sm:$0xff]  ;;  %v36_v12 = vld [vmem:[%s299_s1 + $0xa0] sm:$0xff] }
   0x5   :  { %63 = vmatpush1.msra.mxu0 %v44_v3  ;;  %v35_v13 = vld [vmem:[%s299_s1 + $0x98] sm:$0xff]  ;;  %v34_v14 = vld [vmem:[%s299_s1 + $0x90] sm:$0xff] }
   0x6   :  { %64 = vmatprep.subr.mxu0 %v43_v5 }
   0x7   :  { %65 = vmatpush1.msra.mxu0 %v42_v6 }
   0x8   :  { %66 = vmatprep.subr.mxu0 %v41_v7 }
   0x9   :  { %67 = vmatpush1.msra.mxu0 %v40_v8 }
   0xa   :  { %68 = vmatprep.subr.mxu0 %v39_v9 }
   0xb   :  { %69 = vmatpush1.msra.mxu0 %v38_v10 }
   0xc   :  { %70 = vmatprep.subr.mxu0 %v37_v11 }
   0xd   :  { %8 = vsyncpa [#allocation3], 0  ;;  %71 = vmatpush1.msra.mxu0 %v36_v12  ;;  %v33_v15 = vld [vmem:[%s299_s1 + $0x88] sm:$0xff]  ;;  %v32_v16 = vld [vmem:[%s299_s1 + $0x80] sm:$0xff]  ;;  %v50_v34 = vlaneseq }
   0xe   :  { %72 = vmatprep.subr.mxu0 %v35_v13  ;;  %v31_v17 = vld [vmem:[%s299_s1 + $0x78] sm:$0xff]  ;;  %v30_v18 = vld [vmem:[%s299_s1 + $0x70] sm:$0xff]  ;;  %v29_v19 = vld [vmem:[%s299_s1 + $0x68] sm:$0xff] }
   0xf   :  { %73 = vmatpush1.msra.mxu0 %v34_v14  ;;  %v28_v20 = vld [vmem:[%s299_s1 + $0x60] sm:$0xff]  ;;  %v27_v21 = vld [vmem:[%s299_s1 + $0x58] sm:$0xff]  ;;  %v26_v22 = vld [vmem:[%s299_s1 + $0x50] sm:$0xff]  ;;  %v51_v35 = vshrl.u32 %v50_v34, 7 }
  0x10   :  { %74 = vmatprep.subr.mxu0 %v33_v15  ;;  %v25_v23 = vld [vmem:[%s299_s1 + $0x48] sm:$0xff]  ;;  %v24_v24 = vld [vmem:[%s299_s1 + $0x40] sm:$0xff]  ;;  %v23_v25 = vld [vmem:[%s299_s1 + $0x38] sm:$0xff] }
  0x11   :  { %75 = vmatpush1.msra.mxu0 %v32_v16  ;;  %v22_v26 = vld [vmem:[%s299_s1 + $0x30] sm:$0xff]  ;;  %v21_v27 = vld [vmem:[%s299_s1 + $0x28] sm:$0xff]  ;;  %v20_v28 = vld [vmem:[%s299_s1 + $0x20] sm:$0xff]  ;;  %v52_v36 = vsub.s32 0, %v51_v35  ;;  %v56_v37 = vsub.s32 1, %v51_v35 }
  0x12   :  { %76 = vmatprep.subr.mxu0 %v31_v17  ;;  %v19_v29 = vld [vmem:[%s299_s1 + $0x18] sm:$0xff]  ;;  %v18_v30 = vld [vmem:[%s299_s1 + $0x10] sm:$0xff]  ;;  %v17_v31 = vld [vmem:[%s299_s1 + $0x8] sm:$0xff] }
  0x13   :  { %77 = vmatpush1.msra.mxu0 %v30_v18  ;;  %v16_v32 = vld [vmem:[%s299_s1] sm:$0xff]  ;;  %s172_s1 = smov [#allocation2]  }
  0x14   :  { %78 = vmatprep.subr.mxu0 %v29_v19  ;;  %v15_v33 = vld [vmem:[%s298_s0] sm:$0xff]  ;;  %s139_s26 = sshll.u32 %s172_s1, 4  ;;  %s140_s26 = int_to_ptr.vmem [resolvable:$true] %s139_s26 }
  0x15   :  { %79 = vmatpush1.msra.mxu0 %v28_v20  ;;  %v48_v38 = vld [vmem:[%s300_s2] sm:$0x3]  ;;  %s149_s0 = scalar_lea.vmem %s140_s26, 128  ;;  %p154_p1 = scmp.lt.s32.totalorder %s140_s26, %s140_s26 }
  0x16   :  { %80 = vmatprep.subr.mxu0 %v27_v21  ;;  %v53_v39 = vrot.slane %v48_v38, %v52_v36  ;;  %v57_v40 = vrot.slane %v48_v38, %v56_v37  ;;  %p150_p0 = scmp.ne.s32.totalorder %s140_s26, %s149_s0  ;;  %p155_p2 = scmp.lt.s32.totalorder %s149_s0, %s149_s0 }
  0x17   :  { %81 = vmatpush1.msra.mxu0 %v26_v22 }
  0x18   :  { %82 = vmatprep.subr.mxu0 %v25_v23  ;;  %p156_p3 = por %p155_p2, %p154_p1 }
  0x19   :  { %83 = vmatpush1.msra.mxu0 %v24_v24 }
  0x1a   :  { %84 = vmatprep.subr.mxu0 %v23_v25  ;;  %p157_p4 = pnand %p156_p3, %p150_p0 }
  0x1b   :  { %85 = vmatpush1.msra.mxu0 %v22_v26 }
  0x1c   :  { %86 = vmatprep.subr.mxu0 %v21_v27 }
  0x1d   :  { %87 = vmatpush1.msra.mxu0 %v20_v28 }
  0x1e   :  { %88 = vmatprep.subr.mxu0 %v19_v29 }
  0x1f   :  { %89 = vmatpush1.msra.mxu0 %v18_v30 }
  0x20   :  { %90 = vmatprep.subr.mxu0 %v17_v31 }
  0x21   :  { %91 = vmatpush1.msra.mxu0 %v16_v32 }
  0x22   :  { %125 = vmatmul.mubr.f32.vlgmr.msra.gmra.mxu0 %v15_v33 }
  0xe2   :  { %v126_v41 = vpop.f32.mrf.mxu0 }
  0xe3   :  { %v127_v43 = vadd.f32 %v126_v41, %v53_v39 }
  0xe4   :  { %v128_v42 = vpop.f32.mrf.mxu0 }
  0xe5   :  { %v129_v44 = vadd.f32 %v128_v42, %v57_v40 }
  0xe7   :  { %v131_v45 = vmax.f32 %v127_v43, %v129_v44 }
  0xe9   :  { %132 = vst [vmem:[#allocation2] sm:$0xff] %v131_v45 }
  0xea   :  { %160 = shalt.err (!%p157_p4)
}
  0xeb   :  { %142 = dma.vmem_to_hbm [thread:$0]  %s140_s26, 128, %s301_s3, [#allocation3]  }
  0xec   :  { %169 = dma.done.wait [#allocation3], 128  }
  0xed   :  { %170 = vsyncadd [#allocation3], 4294967168 }
  0xee   :  { %146 = vsyncpa [#allocation3], 1 }

</bundles_post_ra>
